<compile_context>
chip_gen: v7x
topology: tpu7x:2x2x1
jax: 0.10.0
libtpu: 0.0.40
codegen_flags: <defaults>
</compile_context>

<pallas_src>
import functools

import jax
import jax.numpy as jnp
from jax import lax
from jax.experimental import pallas as pl
from jax.experimental.pallas import tpu as pltpu


_LANES = 128
_CHUNK = 128                      # counts sub-tile (lane) width
_VMEM_BUDGET = 20 * 1024 * 1024   # target working set (under the scoped limit)
_VMEM_LIMIT = 32 * 1024 * 1024    # safe scoped-VMEM limit on v5e/v6e/v7x
_GATHER_MIN_VOCAB = 4096          # below this the matmul path always wins
_GATHER_MAX_IDS_SMEM = 256 * 1024  # keep the prefetched id table small in SMEM


def _round_up(x, m):
    return (x + m - 1) // m * m


# ---------------------------------------------------------------------------
# Path 1: fused one-hot matmul (small / medium vocabulary)
# ---------------------------------------------------------------------------
def _bow_matmul_kernel(ids_ref, emb_ref, bias_ref, out_ref):
    """One (batch-tile, vocab-tile) grid step.

    ids_ref : [tb, T]   int32   token ids for this batch tile
    emb_ref : [tv, Dp]  float32 vocab slice of the (D-padded) embedding table
    bias_ref: [1,  Dp]  float32
    out_ref : [tb, Dp]  float32 resident accumulator (same block across vocab axis)
    """
    v_idx = pl.program_id(1)
    tv, _ = emb_ref.shape
    tb, T = ids_ref.shape

    @pl.when(v_idx == 0)
    def _init():
        out_ref[...] = jnp.broadcast_to(bias_ref[...], out_ref.shape)

    # Vocab-tile offset hoisted out of the token loop (one int sub on [tb, T]).
    ids_v = ids_ref[...] - v_idx * tv

    acc = None
    for c in range(tv // _CHUNK):            # static; tv is a multiple of _CHUNK
        # Lane ids of this sub-chunk (compile-time constant vregs).
        lane = c * _CHUNK + lax.broadcasted_iota(jnp.int32, (tb, _CHUNK), 1)
        counts = jnp.zeros((tb, _CHUNK), jnp.int32)
        if T <= 32:
            for t in range(T):               # short static loop -> unrolled
                counts = counts + (ids_v[:, t:t + 1] == lane)
        else:
            def _tok(t, cnt, _lane=lane):
                tok = lax.dynamic_slice_in_dim(ids_v, t, 1, axis=1)
                return cnt + (tok == _lane)
            counts = lax.fori_loop(0, T, _tok, counts, unroll=8)
        part = jnp.dot(counts.astype(jnp.float32),
                       emb_ref[pl.ds(c * _CHUNK, _CHUNK), :],
                       preferred_element_type=jnp.float32)
        acc = part if acc is None else acc + part

    out_ref[...] += acc


def _bow_matmul(ids, emb_table, bias):
    B, T = ids.shape
    V, D = emb_table.shape
    Dp = _round_up(D, _LANES)                # lane-dense output store

    # ---- tile sizing against an explicit VMEM budget (double buffers) ----
    b_budget = _VMEM_BUDGET // 4
    tile_b_cap = max(8, (b_budget // (2 * (Dp + T) * 4)) // 8 * 8)
    tile_b = min(_round_up(B, 8), 256, tile_b_cap)   # fewer batch tiles =>
    Bp = _round_up(B, tile_b)                        # table streamed fewer times

    used_b = 2 * tile_b * (Dp + T) * 4
    v_budget = max(_VMEM_BUDGET - used_b, 2 * _CHUNK * Dp * 4)
    tile_v_cap = max(_CHUNK, (v_budget // (2 * Dp * 4)) // _CHUNK * _CHUNK)
    tile_v = min(_round_up(V, _CHUNK), tile_v_cap, 2048)
    Vp = _round_up(V, tile_v)

    ids_p = jnp.pad(ids.astype(jnp.int32), ((0, Bp - B), (0, 0)))
    emb_p = jnp.pad(emb_table, ((0, Vp - V), (0, Dp - D)))
    bias_p = jnp.pad(bias.reshape(1, D), ((0, 0), (0, Dp - D)))

    grid = (Bp // tile_b, Vp // tile_v)

    cost = pl.CostEstimate(
        flops=2 * Bp * Vp * Dp + T * Bp * Vp,          # MXU + one-hot build
        transcendentals=0,
        bytes_accessed=(ids_p.size * 4
                        + emb_p.size * 4 * grid[0]     # table streamed per batch tile
                        + bias_p.size * 4
                        + Bp * Dp * 4),
    )

    out_p = pl.pallas_call(
        _bow_matmul_kernel,
        out_shape=jax.ShapeDtypeStruct((Bp, Dp), emb_table.dtype),
        grid_spec=pltpu.PrefetchScalarGridSpec(
            num_scalar_prefetch=0,
            grid=grid,
            in_specs=[
                pl.BlockSpec((tile_b, T), lambda b, v: (b, 0)),    # ids
                pl.BlockSpec((tile_v, Dp), lambda b, v: (v, 0)),   # emb slice
                pl.BlockSpec((1, Dp), lambda b, v: (0, 0)),        # bias
            ],
            out_specs=pl.BlockSpec((tile_b, Dp), lambda b, v: (b, 0)),
        ),
        compiler_params=pltpu.CompilerParams(
            dimension_semantics=("parallel", "arbitrary"),
            vmem_limit_bytes=_VMEM_LIMIT,
        ),
        cost_estimate=cost,
    )(ids_p, emb_p, bias_p)

    return out_p[:B, :D]


# ---------------------------------------------------------------------------
# Path 2: manual double-buffered row gather (large vocabulary)
# ---------------------------------------------------------------------------
def _bow_gather_kernel(ids_ref, emb_hbm, bias_ref, out_ref, buf, sems):
    """One (batch-tile, token) grid step.

    ids_ref : SMEM [Bp, T] int32  (scalar-prefetched, full array)
    emb_hbm : HBM  [V, D]  f32    (memory_space=pl.ANY, never loaded wholesale)
    bias_ref: VMEM [1, D]
    out_ref : VMEM [tb, D] resident accumulator (same block across token axis)
    buf     : VMEM [2*tb, D]  double-buffered gathered rows
    sems    : DMA semaphores, one per in-flight row copy
    """
    b = pl.program_id(0)
    t = pl.program_id(1)
    nt = pl.num_programs(1)
    tb = out_ref.shape[0]

    def start_fetch(tok, slot):
        for r in range(tb):                                   # tb is small (8)
            row = ids_ref[b * tb + r, tok]
            idx = slot * tb + r
            pltpu.make_async_copy(emb_hbm.at[row], buf.at[idx],
                                  sems.at[idx]).start()

    def wait_fetch(slot):
        for r in range(tb):
            idx = slot * tb + r
            pltpu.make_async_copy(emb_hbm.at[0], buf.at[idx],
                                  sems.at[idx]).wait()

    @pl.when(t == 0)
    def _first():
        start_fetch(0, 0)
        out_ref[...] = jnp.broadcast_to(bias_ref[...], out_ref.shape)

    slot = t & 1

    @pl.when(t + 1 < nt)
    def _prefetch_next():
        start_fetch(t + 1, 1 - slot)

    wait_fetch(slot)
    base = pl.multiple_of(slot * tb, tb)
    out_ref[...] += buf[pl.ds(base, tb), :]


def _bow_gather(ids, emb_table, bias):
    B, T = ids.shape
    V, D = emb_table.shape

    tb = 8                                   # one sublane group per grid step
    Bp = _round_up(B, tb)
    ids_p = jnp.pad(ids.astype(jnp.int32), ((0, Bp - B), (0, 0)))
    bias2d = bias.reshape(1, D)

    cost = pl.CostEstimate(
        flops=Bp * T * D,
        transcendentals=0,
        bytes_accessed=ids_p.size * 4 + Bp * T * D * 4 + Bp * D * 4 + D * 4,
    )

    out = pl.pallas_call(
        _bow_gather_kernel,
        out_shape=jax.ShapeDtypeStruct((Bp, D), emb_table.dtype),
        grid_spec=pltpu.PrefetchScalarGridSpec(
            num_scalar_prefetch=1,                             # ids -> SMEM
            grid=(Bp // tb, T),
            in_specs=[
                pl.BlockSpec(memory_space=pl.ANY),             # table stays in HBM
                pl.BlockSpec((1, D), lambda b, t, ids: (0, 0)),
            ],
            out_specs=pl.BlockSpec((tb, D), lambda b, t, ids: (b, 0)),
            scratch_shapes=[
                pltpu.VMEM((2 * tb, D), emb_table.dtype),
                pltpu.SemaphoreType.DMA((2 * tb,)),
            ],
        ),
        compiler_params=pltpu.CompilerParams(
            dimension_semantics=("parallel", "arbitrary"),
            vmem_limit_bytes=_VMEM_LIMIT,
        ),
        cost_estimate=cost,
    )(ids_p, emb_table, bias2d)

    return out[:B, :]


# ---------------------------------------------------------------------------
# Dispatch wrapper
# ---------------------------------------------------------------------------
@functools.partial(jax.jit, static_argnames=("force_path",))
def bow_forward(ids, emb_table, bias, *, force_path=None):
    """ids: [B, T] int, emb_table: [V, D] f32, bias: [D] f32 -> [B, D] f32."""
    B, T = ids.shape
    V, D = emb_table.shape

    if force_path is None:
        # HBM-traffic heuristic: matmul path streams the table once per batch
        # tile; gather path reads one row per token (4x small-DMA penalty).
        Dp = _round_up(D, _LANES)
        n_batch_tiles = -(-B // 256)
        matmul_bytes = n_batch_tiles * _round_up(V, _CHUNK) * Dp * 4
        gather_bytes = 4 * B * T * D * 4
        ids_smem_bytes = _round_up(B, 8) * _round_up(T, 128) * 4
        use_gather = (V > _GATHER_MIN_VOCAB
                      and gather_bytes < matmul_bytes
                      and ids_smem_bytes <= _GATHER_MAX_IDS_SMEM)
    else:
        use_gather = force_path == "gather"

    if use_gather:
        return _bow_gather(ids, emb_table, bias)
    return _bow_matmul(ids, emb_table, bias)


if __name__ == "__main__":
    # Small shapes consistent with the module.
    vocab_size = 32       # V
    embedding_dim = 32    # D
    batch = 2             # B
    seq_len = 8           # T

    key = jax.random.PRNGKey(0)
    k_emb, k_ids = jax.random.split(key)

    # Deterministic parameter init (nn.Embedding default ~ N(0,1); bias zeros).
    emb_table = jax.random.normal(k_emb, (vocab_size, embedding_dim), dtype=jnp.float32)
    bias = jnp.zeros((embedding_dim,), dtype=jnp.float32)
    ids = jax.random.randint(k_ids, (batch, seq_len), 0, vocab_size, dtype=jnp.int32)

    # Pure-JAX reference.
    ref = jnp.take(emb_table, ids, axis=0).sum(axis=1) + bias[None, :]

    # Auto path (matmul for this small vocab) and forced gather path.
    out = jax.block_until_ready(bow_forward(ids, emb_table, bias))
    out_g = jax.block_until_ready(bow_forward(ids, emb_table, bias, force_path="gather"))

    assert out.shape == (batch, embedding_dim)
    assert jnp.allclose(out, ref, atol=1e-5, rtol=1e-5), "matmul path mismatch"
    assert jnp.allclose(out_g, ref, atol=1e-5, rtol=1e-5), "gather path mismatch"
    print("KERNEL_OK")
</pallas_src>

<mosaic_0001>
module attributes {stable_mosaic.version = 11 : i64} {
  func.func @_bow_matmul_kernel(%arg0: i32, %arg1: i32, %arg2: memref<8x8xi32, #tpu.memory_space<vmem>>, %arg3: memref<128x128xf32, #tpu.memory_space<vmem>>, %arg4: memref<1x128xf32, #tpu.memory_space<vmem>>, %arg5: memref<8x128xf32, #tpu.memory_space<vmem>>) attributes {dimension_semantics = [#tpu.dimension_semantics<parallel>, #tpu.dimension_semantics<arbitrary>], iteration_bounds = array<i64: 1, 1>, scalar_prefetch = 0 : i64, scratch_operands = 0 : i64, tpu.core_type = #tpu.core_type<tc>, window_params = [{transform_indices = @transform_0, window_bounds = array<i64: 8, 8>}, {transform_indices = @transform_1, window_bounds = array<i64: 128, 128>}, {pipeline_mode = #tpu.pipeline_mode<synchronous>, transform_indices = @transform_2, window_bounds = array<i64: 1, 128>}, {transform_indices = @transform_3, window_bounds = array<i64: 8, 128>}]} {
    %c0_i32 = arith.constant 0 : i32
    %0 = arith.cmpi eq, %arg1, %c0_i32 : i32
    %1 = arith.extui %0 : i1 to i32
    %c0_i32_0 = arith.constant 0 : i32
    %2 = arith.cmpi ne, %1, %c0_i32_0 : i32
    scf.if %2 {
      %c0_10 = arith.constant 0 : index
      %c0_11 = arith.constant 0 : index
      %57 = vector.load %arg4[%c0_10, %c0_11] : memref<1x128xf32, #tpu.memory_space<vmem>>, vector<1x128xf32>
      %58 = vector.shape_cast %57 : vector<1x128xf32> to vector<1x128xf32>
      %59 = vector.broadcast %58 : vector<1x128xf32> to vector<8x128xf32>
      %c0_12 = arith.constant 0 : index
      %c0_13 = arith.constant 0 : index
      %60 = vector.load %arg5[%c0_12, %c0_13] : memref<8x128xf32, #tpu.memory_space<vmem>>, vector<8x128xf32>
      tpu.vector_store %arg5[%c0_12, %c0_13], %59 {strides = array<i32>} : memref<8x128xf32, #tpu.memory_space<vmem>>, vector<8x128xf32>,
    } else {
    }
    %c0 = arith.constant 0 : index
    %c0_1 = arith.constant 0 : index
    %3 = vector.load %arg2[%c0, %c0_1] : memref<8x8xi32, #tpu.memory_space<vmem>>, vector<8x8xi32>
    %c128_i32 = arith.constant 128 : i32
    %4 = arith.muli %arg1, %c128_i32 : i32
    %5 = vector.broadcast %4 : i32 to vector<8x8xi32>
    %6 = arith.subi %3, %5 : vector<8x8xi32>
    %7 = tpu.iota {dimensions = array<i32: 1>} : vector<8x128xi32>
    %c0_i32_2 = arith.constant 0 : i32
    %8 = vector.broadcast %c0_i32_2 : i32 to vector<8x128xi32>
    %9 = arith.addi %8, %7 : vector<8x128xi32>
    %c0_i32_3 = arith.constant 0 : i32
    %10 = vector.broadcast %c0_i32_3 : i32 to vector<8x128xi32>
    %11 = vector.extract_strided_slice %6 {offsets = [0, 0], sizes = [8, 1], strides = [1, 1]} : vector<8x8xi32> to vector<8x1xi32>
    %12 = vector.broadcast %11 : vector<8x1xi32> to vector<8x128xi32>
    %13 = arith.cmpi eq, %12, %9 : vector<8x128xi32>
    %14 = arith.extui %13 : vector<8x128xi1> to vector<8x128xi32>
    %15 = arith.addi %10, %14 : vector<8x128xi32>
    %16 = vector.extract_strided_slice %6 {offsets = [0, 1], sizes = [8, 1], strides = [1, 1]} : vector<8x8xi32> to vector<8x1xi32>
    %17 = vector.broadcast %16 : vector<8x1xi32> to vector<8x128xi32>
    %18 = arith.cmpi eq, %17, %9 : vector<8x128xi32>
    %19 = arith.extui %18 : vector<8x128xi1> to vector<8x128xi32>
    %20 = arith.addi %15, %19 : vector<8x128xi32>
    %21 = vector.extract_strided_slice %6 {offsets = [0, 2], sizes = [8, 1], strides = [1, 1]} : vector<8x8xi32> to vector<8x1xi32>
    %22 = vector.broadcast %21 : vector<8x1xi32> to vector<8x128xi32>
    %23 = arith.cmpi eq, %22, %9 : vector<8x128xi32>
    %24 = arith.extui %23 : vector<8x128xi1> to vector<8x128xi32>
    %25 = arith.addi %20, %24 : vector<8x128xi32>
    %26 = vector.extract_strided_slice %6 {offsets = [0, 3], sizes = [8, 1], strides = [1, 1]} : vector<8x8xi32> to vector<8x1xi32>
    %27 = vector.broadcast %26 : vector<8x1xi32> to vector<8x128xi32>
    %28 = arith.cmpi eq, %27, %9 : vector<8x128xi32>
    %29 = arith.extui %28 : vector<8x128xi1> to vector<8x128xi32>
    %30 = arith.addi %25, %29 : vector<8x128xi32>
    %31 = vector.extract_strided_slice %6 {offsets = [0, 4], sizes = [8, 1], strides = [1, 1]} : vector<8x8xi32> to vector<8x1xi32>
    %32 = vector.broadcast %31 : vector<8x1xi32> to vector<8x128xi32>
    %33 = arith.cmpi eq, %32, %9 : vector<8x128xi32>
    %34 = arith.extui %33 : vector<8x128xi1> to vector<8x128xi32>
    %35 = arith.addi %30, %34 : vector<8x128xi32>
    %36 = vector.extract_strided_slice %6 {offsets = [0, 5], sizes = [8, 1], strides = [1, 1]} : vector<8x8xi32> to vector<8x1xi32>
    %37 = vector.broadcast %36 : vector<8x1xi32> to vector<8x128xi32>
    %38 = arith.cmpi eq, %37, %9 : vector<8x128xi32>
    %39 = arith.extui %38 : vector<8x128xi1> to vector<8x128xi32>
    %40 = arith.addi %35, %39 : vector<8x128xi32>
    %41 = vector.extract_strided_slice %6 {offsets = [0, 6], sizes = [8, 1], strides = [1, 1]} : vector<8x8xi32> to vector<8x1xi32>
    %42 = vector.broadcast %41 : vector<8x1xi32> to vector<8x128xi32>
    %43 = arith.cmpi eq, %42, %9 : vector<8x128xi32>
    %44 = arith.extui %43 : vector<8x128xi1> to vector<8x128xi32>
    %45 = arith.addi %40, %44 : vector<8x128xi32>
    %46 = vector.extract_strided_slice %6 {offsets = [0, 7], sizes = [8, 1], strides = [1, 1]} : vector<8x8xi32> to vector<8x1xi32>
    %47 = vector.broadcast %46 : vector<8x1xi32> to vector<8x128xi32>
    %48 = arith.cmpi eq, %47, %9 : vector<8x128xi32>
    %49 = arith.extui %48 : vector<8x128xi1> to vector<8x128xi32>
    %50 = arith.addi %45, %49 : vector<8x128xi32>
    %51 = arith.sitofp %50 : vector<8x128xi32> to vector<8x128xf32>
    %c0_4 = arith.constant 0 : index
    %c0_5 = arith.constant 0 : index
    %52 = vector.load %arg3[%c0_4, %c0_5] : memref<128x128xf32, #tpu.memory_space<vmem>>, vector<128x128xf32>
    %cst = arith.constant dense<0.000000e+00> : vector<8x128xf32>
    %53 = tpu.matmul %51, %52, %cst {dimension_numbers = #tpu.dot_dimension_numbers<[1], [0], [0], [1], [0, 0, 1, 1], [], []>} : vector<8x128xf32>, vector<128x128xf32>, vector<8x128xf32> -> vector<8x128xf32>
    %c0_6 = arith.constant 0 : index
    %c0_7 = arith.constant 0 : index
    %54 = vector.load %arg5[%c0_6, %c0_7] : memref<8x128xf32, #tpu.memory_space<vmem>>, vector<8x128xf32>
    %55 = arith.addf %54, %53 : vector<8x128xf32>
    %c0_8 = arith.constant 0 : index
    %c0_9 = arith.constant 0 : index
    %56 = vector.load %arg5[%c0_8, %c0_9] : memref<8x128xf32, #tpu.memory_space<vmem>>, vector<8x128xf32>
    tpu.vector_store %arg5[%c0_8, %c0_9], %55 {strides = array<i32>} : memref<8x128xf32, #tpu.memory_space<vmem>>, vector<8x128xf32>,
    return
  }
  func.func @transform_0(%arg0: i32, %arg1: i32) -> (i32, i32) {
    %c0_i32 = arith.constant 0 : i32
    %c0_i32_0 = arith.constant 0 : i32
    return %arg0, %c0_i32 : i32, i32
  }
  func.func @transform_1(%arg0: i32, %arg1: i32) -> (i32, i32) {
    %c0_i32 = arith.constant 0 : i32
    %c0_i32_0 = arith.constant 0 : i32
    return %arg1, %c0_i32 : i32, i32
  }
  func.func @transform_2(%arg0: i32, %arg1: i32) -> (i32, i32) {
    %c0_i32 = arith.constant 0 : i32
    %c0_i32_0 = arith.constant 0 : i32
    %c0_i32_1 = arith.constant 0 : i32
    return %c0_i32, %c0_i32_0 : i32, i32
  }
  func.func @transform_3(%arg0: i32, %arg1: i32) -> (i32, i32) {
    %c0_i32 = arith.constant 0 : i32
    %c0_i32_0 = arith.constant 0 : i32
    return %arg0, %c0_i32 : i32, i32
  }
}

</mosaic_0001>

<bundles_post_ra>
// kernel: bow_forward.1
= control target key start
LH: loop header
LB: loop body
LE: loop exit
PB: predicated region body
PF: predicated region fallthrough
CT: control target
= control target key end

     0   :  { %v270_v0 = vmov 2   ;;  %v271_v1 = vmov 0   ;;  %v272_v7 = vmov 0.0|0.0   ;;  %v273_v10 = vmov 3   ;;  %s367_s0 = inlined_call_operand.vmem [shape: s32[8,8], index: 0, kind: input, shape index: {}]   ;;  %s368_s1 = inlined_call_operand.vmem [shape: f32[128,128], index: 1, kind: input, shape index: {}]   ;;  %s369_s2 = inlined_call_operand.vmem [shape: f32[1,128], index: 2, kind: input, shape index: {}]   ;;  %s370_s3 = inlined_call_operand.vmem [shape: f32[8,128], index: 3, kind: output, shape index: {}]  }
   0x1   :  { %263 = vset.pattern.permute.xlu1 %v270_v0  ;;  %261 = vset.pattern.permute.xlu0 %v271_v1  ;;  %v26_v2 = vld [vmem:[%s367_s0] sm:$0xff]  ;;  %v81_v4 = vld [vmem:[%s368_s1 + $0x8] sm:$0xff]  ;;  %v82_v5 = vld [vmem:[%s368_s1 + $0x10] sm:$0xff]  ;;  %v274_v11 = vmov 1   ;;  %v275_v17 = vmov 4   ;;  %v276_v18 = vmov 5   ;;  %v30_v35 = vlaneseq }
   0x2   :  { %v80_v3 = vld [vmem:[%s368_s1] sm:$0xff]  ;;  %44 = vperm.xlu1 %263, %v26_v2   ;;  %33 = vperm.xlu0 %261, %v26_v2   ;;  %v83_v6 = vld [vmem:[%s368_s1 + $0x18] sm:$0xff]  ;;  %v85_v13 = vld [vmem:[%s368_s1 + $0x28] sm:$0xff]  ;;  %v277_v22 = vmov 6   ;;  %v278_v23 = vmov 7   ;;  %vm279_vm0 = vmmov 0  }
   0x3   :  { %226 = vmatprep.subr.bf16.mxu0 %v272_v7  ;;  %v227_v8 = vpack.c.bf16 %v81_v4, %v80_v3  ;;  %v230_v9 = vpack.c.bf16 %v83_v6, %v82_v5  ;;  %v84_v12 = vld [vmem:[%s368_s1 + $0x20] sm:$0xff]  ;;  %v86_v15 = vld [vmem:[%s368_s1 + $0x30] sm:$0xff]  ;;  %v87_v16 = vld [vmem:[%s368_s1 + $0x38] sm:$0xff]  ;;  %v280_v33 = vmov 0.0   ;;  %v31_v38 = vand.u32 127, %v30_v35 }
   0x4   :  { %v233_v14 = vpack.c.bf16 %v85_v13, %v84_v12  ;;  %v236_v19 = vpack.c.bf16 %v87_v16, %v86_v15  ;;  %v88_v20 = vld [vmem:[%s368_s1 + $0x40] sm:$0xff]  ;;  %v89_v21 = vld [vmem:[%s368_s1 + $0x48] sm:$0xff]  ;;  %v90_v25 = vld [vmem:[%s368_s1 + $0x50] sm:$0xff]  ;;  %223 = vmatprep.mubr.msk.f32.mxu0 %vm279_vm0, %v280_v33 }
   0x5   :  { %228 = vmatpush3.bf16.msra.mxu0 %v227_v8  ;;  %v239_v24 = vpack.c.bf16 %v89_v21, %v88_v20  ;;  %v91_v26 = vld [vmem:[%s368_s1 + $0x58] sm:$0xff]  ;;  %v92_v28 = vld [vmem:[%s368_s1 + $0x60] sm:$0xff]  ;;  %v93_v29 = vld [vmem:[%s368_s1 + $0x68] sm:$0xff] }
   0x6   :  { %264 = vset.pattern.permute.xlu1 %v273_v10  ;;  %262 = vset.pattern.permute.xlu0 %v274_v11  ;;  %v242_v27 = vpack.c.bf16 %v91_v26, %v90_v25  ;;  %v245_v30 = vpack.c.bf16 %v93_v29, %v92_v28  ;;  %v94_v31 = vld [vmem:[%s368_s1 + $0x70] sm:$0xff]  ;;  %v95_v32 = vld [vmem:[%s368_s1 + $0x78] sm:$0xff]  ;;  %v173_v61 = vld [vmem:[%s369_s2] ss:$0 sm:$0xff] }
   0x7   :  { %50 = vperm.xlu1 %264, %v26_v2   ;;  %38 = vperm.xlu0 %262, %v26_v2   ;;  %v248_v34 = vpack.c.bf16 %v95_v32, %v94_v31 }
   0x8   :  { %229 = vmatprep.subr.bf16.mxu0 %v272_v7 }
   0x9   :  { %231 = vmatpush3.bf16.msra.mxu0 %v230_v9 }
   0xa   :  { %232 = vmatprep.subr.bf16.mxu0 %v272_v7 }
   0xb   :  { %265 = vset.pattern.permute.xlu1 %v275_v17  ;;  %266 = vset.pattern.permute.xlu0 %v276_v18 }
   0xc   :  { %56 = vperm.xlu1 %265, %v26_v2   ;;  %62 = vperm.xlu0 %266, %v26_v2  }
   0xd   :  { %234 = vmatpush3.bf16.msra.mxu0 %v233_v14 }
   0xe   :  { %235 = vmatprep.subr.bf16.mxu0 %v272_v7 }
  0x10   :  { %267 = vset.pattern.permute.xlu1 %v277_v22  ;;  %269 = vset.pattern.permute.xlu0 %v278_v23 }
  0x11   :  { %68 = vperm.xlu1 %267, %v26_v2   ;;  %237 = vmatpush3.bf16.msra.mxu0 %v236_v19 }
  0x12   :  { %238 = vmatprep.subr.bf16.mxu0 %v272_v7 }
  0x15   :  { %268 = vset.pattern.permute.xlu1 %v278_v23  ;;  %240 = vmatpush3.bf16.msra.mxu0 %v239_v24 }
  0x16   :  { %74 = vperm.xlu1 %268, %v26_v2   ;;  %241 = vmatprep.subr.bf16.mxu0 %v272_v7 }
  0x19   :  { %243 = vmatpush3.bf16.msra.mxu0 %v242_v27 }
  0x1a   :  { %244 = vmatprep.subr.bf16.mxu0 %v272_v7 }
  0x1d   :  { %246 = vmatpush3.bf16.msra.mxu0 %v245_v30 }
  0x1e   :  { %247 = vmatprep.subr.bf16.mxu0 %v272_v7 }
  0x21   :  { %249 = vmatpush3.bf16.msra.mxu0 %v248_v34 }
  0x81   :  { %v45_v36 = vpop.permute.xlu1 %44  ;;  %v34_v37 = vpop.permute.xlu0 %33 }
  0x82   :  { %vm35_vm1 = vcmp.eq.s32.totalorder %v34_v37, %v31_v38  ;;  %vm46_vm2 = vcmp.eq.s32.totalorder %v45_v36, %v31_v38 }
  0x83   :  { %v36_v41 = vsel %vm35_vm1, 1, %v271_v1  ;;  %v47_v44 = vsel %vm46_vm2, 1, %v271_v1 }
  0x86   :  { %v51_v39 = vpop.permute.xlu1 %50  ;;  %v39_v40 = vpop.permute.xlu0 %38 }
  0x87   :  { %vm40_vm3 = vcmp.eq.s32.totalorder %v39_v40, %v31_v38  ;;  %vm52_vm4 = vcmp.eq.s32.totalorder %v51_v39, %v31_v38 }
  0x88   :  { %v41_v42 = vsel %vm40_vm3, 1, %v271_v1  ;;  %v53_v48 = vsel %vm52_vm4, 1, %v271_v1 }
  0x89   :  { %v42_v43 = vadd.s32 %v41_v42, %v36_v41 }
  0x8b   :  { %v48_v45 = vadd.s32 %v47_v44, %v42_v43  ;;  %v57_v46 = vpop.permute.xlu1 %56  ;;  %v63_v47 = vpop.permute.xlu0 %62 }
  0x8c   :  { %vm58_vm5 = vcmp.eq.s32.totalorder %v57_v46, %v31_v38  ;;  %vm64_vm6 = vcmp.eq.s32.totalorder %v63_v47, %v31_v38 }
  0x8d   :  { %v54_v49 = vadd.s32 %v53_v48, %v48_v45  ;;  %v59_v50 = vsel %vm58_vm5, 1, %v271_v1  ;;  %v65_v52 = vsel %vm64_vm6, 1, %v271_v1 }
  0x8f   :  { %v60_v51 = vadd.s32 %v59_v50, %v54_v49 }
  0x90   :  { %v69_v53 = vpop.permute.xlu1 %68 }
  0x91   :  { %vm70_vm7 = vcmp.eq.s32.totalorder %v69_v53, %v31_v38  ;;  %v66_v54 = vadd.s32 %v65_v52, %v60_v51 }
  0x92   :  { %v71_v55 = vsel %vm70_vm7, 1, %v271_v1 }
  0x93   :  { %v72_v57 = vadd.s32 %v71_v55, %v66_v54 }
  0x95   :  { %v75_v56 = vpop.permute.xlu1 %74 }
  0x96   :  { %vm76_vm8 = vcmp.eq.s32.totalorder %v75_v56, %v31_v38 }
  0x97   :  { %v77_v58 = vsel %vm76_vm8, 1, %v271_v1 }
  0x98   :  { %v78_v59 = vadd.s32 %v77_v58, %v72_v57 }
  0x9a   :  { %v79_v60 = vcvt.s32.f32 %v78_v59 }
  0x9c   :  { %224 = vmatmul.mubr.f32.vlgmr.msra.gmra.mrb[0].mxu0 %v79_v60 }
 0x16f   :  { %v162_v62 = vpop.f32.mrb[0].mxu0 }
 0x170   :  { %v167_v63 = vadd.f32 %v173_v61, %v162_v62  ;;  %v225_v0 = vpop.f32.mrb[1].mxu0 }
 0x172   :  { %168 = vst [vmem:[%s370_s3] sm:$0xff] %v167_v63 }

</bundles_post_ra>
